<compile_context>
chip_gen: v6e
topology: v6e:2x2x1
jax: 0.10.0
libtpu: 0.0.40
codegen_flags: <defaults>
</compile_context>

<pallas_src>
import functools

import numpy as np
import jax
import jax.numpy as jnp
from jax.experimental import pallas as pl
from jax.experimental.pallas import tpu as pltpu


# ----------------------------------------------------------------------------
# Deterministic parameter init: reproduce scipy.ndimage.gaussian_filter applied
# to a centered delta (what GaussianBlurLayer._init_kernel does), without
# scipy. The 2-D response is exactly outer(g1d, g1d), so g1d are the separable
# taps used by the kernel.
# ----------------------------------------------------------------------------
def _scipy_reflect_index(i: int, n: int) -> int:
    # scipy.ndimage 'reflect' boundary: (d c b a | a b c d | d c b a)
    period = 2 * n
    i = i % period
    if i >= n:
        i = period - 1 - i
    return i


def _gaussian_blur_taps_1d(kernel_size: int) -> np.ndarray:
    sigma = 0.3 * ((kernel_size - 1) * 0.5 - 1) + 0.8
    truncate = 4.0  # scipy default
    lw = int(truncate * sigma + 0.5)
    x = np.arange(-lw, lw + 1, dtype=np.float64)
    w = np.exp(-0.5 / (sigma * sigma) * x * x)
    w /= w.sum()

    # correlate1d of a delta at the center, with scipy 'reflect' boundaries
    n = kernel_size
    delta = np.zeros(n, dtype=np.float64)
    delta[n // 2] = 1.0
    g1d = np.zeros(n, dtype=np.float64)
    for out_i in range(n):
        acc = 0.0
        for j in range(2 * lw + 1):
            src = out_i + j - lw
            acc += w[j] * delta[_scipy_reflect_index(src, n)]
        g1d[out_i] = acc
    return g1d


def _gaussian_blur_kernel_2d(kernel_size: int) -> np.ndarray:
    g1d = _gaussian_blur_taps_1d(kernel_size)
    return np.outer(g1d, g1d).astype(np.float32)


# ----------------------------------------------------------------------------
# Pallas kernel: separable depthwise Gaussian blur with in-kernel reflection
# padding. Lanes carry the folded (N*C) axis.
# ----------------------------------------------------------------------------
def _blur_kernel(x_ref, o_ref, xw_ref, th_ref, *, taps, pad):
    """x_ref/o_ref: (H, W, LB); xw_ref: (H, W+2p, LB); th_ref: (H+2p, W, LB)."""
    p = pad
    k = len(taps)
    h, w, _ = x_ref.shape

    x = x_ref[...].astype(jnp.float32)

    # ---- reflect-pad along W into VMEM scratch (no HBM round trip) ----
    xw_ref[:, p:p + w, :] = x
    for j in range(1, p + 1):
        xw_ref[:, p - j, :] = x[:, j, :]                   # left border
        xw_ref[:, p + w - 1 + j, :] = x[:, w - 1 - j, :]   # right border

    # ---- horizontal 1-D pass (K taps, float immediates) ----
    t = taps[0] * xw_ref[:, 0:w, :]
    for j in range(1, k):
        t = t + taps[j] * xw_ref[:, j:j + w, :]

    # ---- reflect-pad the horizontal result along H into VMEM scratch ----
    th_ref[p:p + h, :, :] = t
    for i in range(1, p + 1):
        th_ref[p - i, :, :] = t[i, :, :]                   # top border
        th_ref[p + h - 1 + i, :, :] = t[h - 1 - i, :, :]   # bottom border

    # ---- vertical 1-D pass ----
    acc = taps[0] * th_ref[0:h, :, :]
    for i in range(1, k):
        acc = acc + taps[i] * th_ref[i:i + h, :, :]

    o_ref[...] = acc.astype(o_ref.dtype)


def _choose_lane_block(ncp: int, h: int, w: int, p: int,
                       budget_bytes: int = 20 * 1024 * 1024) -> int:
    """Largest 128-multiple lane block that divides ncp and fits the budget."""
    per_lane = 4 * (4 * h * w                              # dbl-buffered in+out
                    + h * (w + 2 * p) + (h + 2 * p) * w    # scratches
                    + 3 * h * w)                           # live temps margin
    lb = 128
    while (lb * 2 <= ncp) and (ncp % (lb * 2) == 0) and (per_lane * lb * 2 <= budget_bytes):
        lb *= 2
    return lb


def gaussian_blur(x: jax.Array, channels: int, kernel_size: int) -> jax.Array:
    """Forward pass of GaussianBlurLayer. x: (N, C, H, W)."""
    assert x.ndim == 4, "'GaussianBlurLayer' requires a 4D tensor as input"
    assert x.shape[1] == channels, "channel mismatch"
    assert kernel_size % 2 != 0

    N, C, H, W = x.shape
    p = kernel_size // 2
    assert p < H and p < W, "reflection pad requires pad < spatial dims"

    taps = tuple(float(t) for t in _gaussian_blur_taps_1d(kernel_size))

    NC = N * C
    LANE = 128
    NCp = ((NC + LANE - 1) // LANE) * LANE

    # (N, C, H, W) -> (H, W, N*C): put the independent batch*channel axis on
    # lanes; zero-pad lanes to a multiple of 128 (dense, unmasked stores).
    x_t = jnp.transpose(x.reshape(NC, H, W), (1, 2, 0))
    if NCp != NC:
        x_t = jnp.pad(x_t, ((0, 0), (0, 0), (0, NCp - NC)))

    LB = _choose_lane_block(NCp, H, W, p)
    grid = (NCp // LB,)

    kernel_fn = functools.partial(_blur_kernel, taps=taps, pad=p)

    flops = 4 * kernel_size * NCp * H * W          # separable: 2 passes x K MACs
    bytes_accessed = 2 * H * W * NCp * x.dtype.itemsize

    out_t = pl.pallas_call(
        kernel_fn,
        out_shape=jax.ShapeDtypeStruct((H, W, NCp), x.dtype),
        grid=grid,
        in_specs=[pl.BlockSpec((H, W, LB), lambda b: (0, 0, b))],
        out_specs=pl.BlockSpec((H, W, LB), lambda b: (0, 0, b)),
        scratch_shapes=[
            pltpu.VMEM((H, W + 2 * p, LB), jnp.float32),
            pltpu.VMEM((H + 2 * p, W, LB), jnp.float32),
        ],
        compiler_params=pltpu.CompilerParams(
            dimension_semantics=("parallel",),
            vmem_limit_bytes=32 * 1024 * 1024,
        ),
        cost_estimate=pl.CostEstimate(
            flops=flops, transcendentals=0, bytes_accessed=bytes_accessed),
    )(x_t)

    # back to (N, C, H, W), dropping the zero-padded lanes
    out = jnp.transpose(out_t[:, :, :NC], (2, 0, 1)).reshape(N, C, H, W)
    return out


# ----------------------------------------------------------------------------
# Pure-JAX reference (dense 2-D accumulation, independent of the separable
# in-kernel path) for a correctness check.
# ----------------------------------------------------------------------------
def _reference(x, channels, kernel_size):
    p = kernel_size // 2
    x_pad = jnp.pad(x, ((0, 0), (0, 0), (p, p), (p, p)), mode="reflect")
    kern = jnp.asarray(_gaussian_blur_kernel_2d(kernel_size))
    N, C, H, W = x.shape
    acc = jnp.zeros((N, C, H, W), jnp.float32)
    for i in range(kernel_size):
        for j in range(kernel_size):
            acc = acc + kern[i, j] * x_pad[:, :, i:i + H, j:j + W]
    return acc.astype(x.dtype)


if __name__ == "__main__":
    channels = 4
    kernel_size = 5
    key = jax.random.PRNGKey(0)
    x = jax.random.normal(key, (2, channels, 16, 16), dtype=jnp.float32)

    blur = jax.jit(functools.partial(
        gaussian_blur, channels=channels, kernel_size=kernel_size))
    y = blur(x)
    y = jax.block_until_ready(y)

    y_ref = _reference(x, channels, kernel_size)
    assert y.shape == (2, channels, 16, 16)
    assert jnp.allclose(y, y_ref, atol=1e-5, rtol=1e-5)

    print("KERNEL_OK")
</pallas_src>

<mosaic_0001>
module attributes {stable_mosaic.version = 11 : i64} {
  func.func @_blur_kernel(%arg0: i32, %arg1: memref<16x16x128xf32, #tpu.memory_space<vmem>>, %arg2: memref<16x16x128xf32, #tpu.memory_space<vmem>>, %arg3: memref<16x20x128xf32, #tpu.memory_space<vmem>>, %arg4: memref<20x16x128xf32, #tpu.memory_space<vmem>>) attributes {dimension_semantics = [#tpu.dimension_semantics<parallel>], iteration_bounds = array<i64: 1>, scalar_prefetch = 0 : i64, scratch_operands = 2 : i64, tpu.core_type = #tpu.core_type<tc>, window_params = [{transform_indices = @transform_0, window_bounds = array<i64: 16, 16, 128>}, {transform_indices = @transform_1, window_bounds = array<i64: 16, 16, 128>}]} {
    %c0 = arith.constant 0 : index
    %c0_0 = arith.constant 0 : index
    %c0_1 = arith.constant 0 : index
    %0 = vector.load %arg1[%c0, %c0_0, %c0_1] : memref<16x16x128xf32, #tpu.memory_space<vmem>>, vector<16x16x128xf32>
    %c0_2 = arith.constant 0 : index
    %c2 = arith.constant 2 : index
    %c0_3 = arith.constant 0 : index
    %1 = vector.load %arg3[%c0_2, %c2, %c0_3] : memref<16x20x128xf32, #tpu.memory_space<vmem>>, vector<16x16x128xf32>
    tpu.vector_store %arg3[%c0_2, %c2, %c0_3], %0 {strides = array<i32>} : memref<16x20x128xf32, #tpu.memory_space<vmem>>, vector<16x16x128xf32>,
    %2 = vector.extract_strided_slice %0 {offsets = [0, 1, 0], sizes = [16, 1, 128], strides = [1, 1, 1]} : vector<16x16x128xf32> to vector<16x1x128xf32>
    %3 = vector.shape_cast %2 : vector<16x1x128xf32> to vector<16x128xf32>
    %c0_4 = arith.constant 0 : index
    %c1 = arith.constant 1 : index
    %c0_5 = arith.constant 0 : index
    %4 = vector.load %arg3[%c0_4, %c1, %c0_5] : memref<16x20x128xf32, #tpu.memory_space<vmem>>, vector<16x1x128xf32>
    %5 = vector.shape_cast %4 : vector<16x1x128xf32> to vector<16x128xf32>
    %6 = vector.shape_cast %3 : vector<16x128xf32> to vector<16x1x128xf32>
    tpu.vector_store %arg3[%c0_4, %c1, %c0_5], %6 {strides = array<i32>} : memref<16x20x128xf32, #tpu.memory_space<vmem>>, vector<16x1x128xf32>,
    %7 = vector.extract_strided_slice %0 {offsets = [0, 14, 0], sizes = [16, 1, 128], strides = [1, 1, 1]} : vector<16x16x128xf32> to vector<16x1x128xf32>
    %8 = vector.shape_cast %7 : vector<16x1x128xf32> to vector<16x128xf32>
    %c0_6 = arith.constant 0 : index
    %c18 = arith.constant 18 : index
    %c0_7 = arith.constant 0 : index
    %9 = vector.load %arg3[%c0_6, %c18, %c0_7] : memref<16x20x128xf32, #tpu.memory_space<vmem>>, vector<16x1x128xf32>
    %10 = vector.shape_cast %9 : vector<16x1x128xf32> to vector<16x128xf32>
    %11 = vector.shape_cast %8 : vector<16x128xf32> to vector<16x1x128xf32>
    tpu.vector_store %arg3[%c0_6, %c18, %c0_7], %11 {strides = array<i32>} : memref<16x20x128xf32, #tpu.memory_space<vmem>>, vector<16x1x128xf32>,
    %12 = vector.extract_strided_slice %0 {offsets = [0, 2, 0], sizes = [16, 1, 128], strides = [1, 1, 1]} : vector<16x16x128xf32> to vector<16x1x128xf32>
    %13 = vector.shape_cast %12 : vector<16x1x128xf32> to vector<16x128xf32>
    %c0_8 = arith.constant 0 : index
    %c0_9 = arith.constant 0 : index
    %c0_10 = arith.constant 0 : index
    %14 = vector.load %arg3[%c0_8, %c0_9, %c0_10] : memref<16x20x128xf32, #tpu.memory_space<vmem>>, vector<16x1x128xf32>
    %15 = vector.shape_cast %14 : vector<16x1x128xf32> to vector<16x128xf32>
    %16 = vector.shape_cast %13 : vector<16x128xf32> to vector<16x1x128xf32>
    tpu.vector_store %arg3[%c0_8, %c0_9, %c0_10], %16 {strides = array<i32>} : memref<16x20x128xf32, #tpu.memory_space<vmem>>, vector<16x1x128xf32>,
    %17 = vector.extract_strided_slice %0 {offsets = [0, 13, 0], sizes = [16, 1, 128], strides = [1, 1, 1]} : vector<16x16x128xf32> to vector<16x1x128xf32>
    %18 = vector.shape_cast %17 : vector<16x1x128xf32> to vector<16x128xf32>
    %c0_11 = arith.constant 0 : index
    %c19 = arith.constant 19 : index
    %c0_12 = arith.constant 0 : index
    %19 = vector.load %arg3[%c0_11, %c19, %c0_12] : memref<16x20x128xf32, #tpu.memory_space<vmem>>, vector<16x1x128xf32>
    %20 = vector.shape_cast %19 : vector<16x1x128xf32> to vector<16x128xf32>
    %21 = vector.shape_cast %18 : vector<16x128xf32> to vector<16x1x128xf32>
    tpu.vector_store %arg3[%c0_11, %c19, %c0_12], %21 {strides = array<i32>} : memref<16x20x128xf32, #tpu.memory_space<vmem>>, vector<16x1x128xf32>,
    %c0_13 = arith.constant 0 : index
    %c0_14 = arith.constant 0 : index
    %c0_15 = arith.constant 0 : index
    %22 = vector.load %arg3[%c0_13, %c0_14, %c0_15] : memref<16x20x128xf32, #tpu.memory_space<vmem>>, vector<16x16x128xf32>
    %cst = arith.constant 0.0782501251 : f32
    %23 = vector.broadcast %cst : f32 to vector<16x16x128xf32>
    %24 = arith.mulf %23, %22 : vector<16x16x128xf32>
    %c0_16 = arith.constant 0 : index
    %c1_17 = arith.constant 1 : index
    %c0_18 = arith.constant 0 : index
    %25 = vector.load %arg3[%c0_16, %c1_17, %c0_18] : memref<16x20x128xf32, #tpu.memory_space<vmem>>, vector<16x16x128xf32>
    %cst_19 = arith.constant 0.240408137 : f32
    %26 = vector.broadcast %cst_19 : f32 to vector<16x16x128xf32>
    %27 = arith.mulf %26, %25 : vector<16x16x128xf32>
    %28 = arith.addf %24, %27 : vector<16x16x128xf32>
    %c0_20 = arith.constant 0 : index
    %c2_21 = arith.constant 2 : index
    %c0_22 = arith.constant 0 : index
    %29 = vector.load %arg3[%c0_20, %c2_21, %c0_22] : memref<16x20x128xf32, #tpu.memory_space<vmem>>, vector<16x16x128xf32>
    %cst_23 = arith.constant 0.362683475 : f32
    %30 = vector.broadcast %cst_23 : f32 to vector<16x16x128xf32>
    %31 = arith.mulf %30, %29 : vector<16x16x128xf32>
    %32 = arith.addf %28, %31 : vector<16x16x128xf32>
    %c0_24 = arith.constant 0 : index
    %c3 = arith.constant 3 : index
    %c0_25 = arith.constant 0 : index
    %33 = vector.load %arg3[%c0_24, %c3, %c0_25] : memref<16x20x128xf32, #tpu.memory_space<vmem>>, vector<16x16x128xf32>
    %cst_26 = arith.constant 0.240408137 : f32
    %34 = vector.broadcast %cst_26 : f32 to vector<16x16x128xf32>
    %35 = arith.mulf %34, %33 : vector<16x16x128xf32>
    %36 = arith.addf %32, %35 : vector<16x16x128xf32>
    %c0_27 = arith.constant 0 : index
    %c4 = arith.constant 4 : index
    %c0_28 = arith.constant 0 : index
    %37 = vector.load %arg3[%c0_27, %c4, %c0_28] : memref<16x20x128xf32, #tpu.memory_space<vmem>>, vector<16x16x128xf32>
    %cst_29 = arith.constant 0.0782501251 : f32
    %38 = vector.broadcast %cst_29 : f32 to vector<16x16x128xf32>
    %39 = arith.mulf %38, %37 : vector<16x16x128xf32>
    %40 = arith.addf %36, %39 : vector<16x16x128xf32>
    %c2_30 = arith.constant 2 : index
    %c0_31 = arith.constant 0 : index
    %c0_32 = arith.constant 0 : index
    %41 = vector.load %arg4[%c2_30, %c0_31, %c0_32] : memref<20x16x128xf32, #tpu.memory_space<vmem>>, vector<16x16x128xf32>
    tpu.vector_store %arg4[%c2_30, %c0_31, %c0_32], %40 {strides = array<i32>} : memref<20x16x128xf32, #tpu.memory_space<vmem>>, vector<16x16x128xf32>,
    %42 = vector.extract_strided_slice %40 {offsets = [1, 0, 0], sizes = [1, 16, 128], strides = [1, 1, 1]} : vector<16x16x128xf32> to vector<1x16x128xf32>
    %43 = vector.shape_cast %42 : vector<1x16x128xf32> to vector<16x128xf32>
    %c1_33 = arith.constant 1 : index
    %c0_34 = arith.constant 0 : index
    %c0_35 = arith.constant 0 : index
    %44 = vector.load %arg4[%c1_33, %c0_34, %c0_35] : memref<20x16x128xf32, #tpu.memory_space<vmem>>, vector<1x16x128xf32>
    %45 = vector.shape_cast %44 : vector<1x16x128xf32> to vector<16x128xf32>
    %46 = vector.shape_cast %43 : vector<16x128xf32> to vector<1x16x128xf32>
    tpu.vector_store %arg4[%c1_33, %c0_34, %c0_35], %46 {strides = array<i32>} : memref<20x16x128xf32, #tpu.memory_space<vmem>>, vector<1x16x128xf32>,
    %47 = vector.extract_strided_slice %40 {offsets = [14, 0, 0], sizes = [1, 16, 128], strides = [1, 1, 1]} : vector<16x16x128xf32> to vector<1x16x128xf32>
    %48 = vector.shape_cast %47 : vector<1x16x128xf32> to vector<16x128xf32>
    %c18_36 = arith.constant 18 : index
    %c0_37 = arith.constant 0 : index
    %c0_38 = arith.constant 0 : index
    %49 = vector.load %arg4[%c18_36, %c0_37, %c0_38] : memref<20x16x128xf32, #tpu.memory_space<vmem>>, vector<1x16x128xf32>
    %50 = vector.shape_cast %49 : vector<1x16x128xf32> to vector<16x128xf32>
    %51 = vector.shape_cast %48 : vector<16x128xf32> to vector<1x16x128xf32>
    tpu.vector_store %arg4[%c18_36, %c0_37, %c0_38], %51 {strides = array<i32>} : memref<20x16x128xf32, #tpu.memory_space<vmem>>, vector<1x16x128xf32>,
    %52 = vector.extract_strided_slice %40 {offsets = [2, 0, 0], sizes = [1, 16, 128], strides = [1, 1, 1]} : vector<16x16x128xf32> to vector<1x16x128xf32>
    %53 = vector.shape_cast %52 : vector<1x16x128xf32> to vector<16x128xf32>
    %c0_39 = arith.constant 0 : index
    %c0_40 = arith.constant 0 : index
    %c0_41 = arith.constant 0 : index
    %54 = vector.load %arg4[%c0_39, %c0_40, %c0_41] : memref<20x16x128xf32, #tpu.memory_space<vmem>>, vector<1x16x128xf32>
    %55 = vector.shape_cast %54 : vector<1x16x128xf32> to vector<16x128xf32>
    %56 = vector.shape_cast %53 : vector<16x128xf32> to vector<1x16x128xf32>
    tpu.vector_store %arg4[%c0_39, %c0_40, %c0_41], %56 {strides = array<i32>} : memref<20x16x128xf32, #tpu.memory_space<vmem>>, vector<1x16x128xf32>,
    %57 = vector.extract_strided_slice %40 {offsets = [13, 0, 0], sizes = [1, 16, 128], strides = [1, 1, 1]} : vector<16x16x128xf32> to vector<1x16x128xf32>
    %58 = vector.shape_cast %57 : vector<1x16x128xf32> to vector<16x128xf32>
    %c19_42 = arith.constant 19 : index
    %c0_43 = arith.constant 0 : index
    %c0_44 = arith.constant 0 : index
    %59 = vector.load %arg4[%c19_42, %c0_43, %c0_44] : memref<20x16x128xf32, #tpu.memory_space<vmem>>, vector<1x16x128xf32>
    %60 = vector.shape_cast %59 : vector<1x16x128xf32> to vector<16x128xf32>
    %61 = vector.shape_cast %58 : vector<16x128xf32> to vector<1x16x128xf32>
    tpu.vector_store %arg4[%c19_42, %c0_43, %c0_44], %61 {strides = array<i32>} : memref<20x16x128xf32, #tpu.memory_space<vmem>>, vector<1x16x128xf32>,
    %c0_45 = arith.constant 0 : index
    %c0_46 = arith.constant 0 : index
    %c0_47 = arith.constant 0 : index
    %62 = vector.load %arg4[%c0_45, %c0_46, %c0_47] : memref<20x16x128xf32, #tpu.memory_space<vmem>>, vector<16x16x128xf32>
    %cst_48 = arith.constant 0.0782501251 : f32
    %63 = vector.broadcast %cst_48 : f32 to vector<16x16x128xf32>
    %64 = arith.mulf %63, %62 : vector<16x16x128xf32>
    %c1_49 = arith.constant 1 : index
    %c0_50 = arith.constant 0 : index
    %c0_51 = arith.constant 0 : index
    %65 = vector.load %arg4[%c1_49, %c0_50, %c0_51] : memref<20x16x128xf32, #tpu.memory_space<vmem>>, vector<16x16x128xf32>
    %cst_52 = arith.constant 0.240408137 : f32
    %66 = vector.broadcast %cst_52 : f32 to vector<16x16x128xf32>
    %67 = arith.mulf %66, %65 : vector<16x16x128xf32>
    %68 = arith.addf %64, %67 : vector<16x16x128xf32>
    %c2_53 = arith.constant 2 : index
    %c0_54 = arith.constant 0 : index
    %c0_55 = arith.constant 0 : index
    %69 = vector.load %arg4[%c2_53, %c0_54, %c0_55] : memref<20x16x128xf32, #tpu.memory_space<vmem>>, vector<16x16x128xf32>
    %cst_56 = arith.constant 0.362683475 : f32
    %70 = vector.broadcast %cst_56 : f32 to vector<16x16x128xf32>
    %71 = arith.mulf %70, %69 : vector<16x16x128xf32>
    %72 = arith.addf %68, %71 : vector<16x16x128xf32>
    %c3_57 = arith.constant 3 : index
    %c0_58 = arith.constant 0 : index
    %c0_59 = arith.constant 0 : index
    %73 = vector.load %arg4[%c3_57, %c0_58, %c0_59] : memref<20x16x128xf32, #tpu.memory_space<vmem>>, vector<16x16x128xf32>
    %cst_60 = arith.constant 0.240408137 : f32
    %74 = vector.broadcast %cst_60 : f32 to vector<16x16x128xf32>
    %75 = arith.mulf %74, %73 : vector<16x16x128xf32>
    %76 = arith.addf %72, %75 : vector<16x16x128xf32>
    %c4_61 = arith.constant 4 : index
    %c0_62 = arith.constant 0 : index
    %c0_63 = arith.constant 0 : index
    %77 = vector.load %arg4[%c4_61, %c0_62, %c0_63] : memref<20x16x128xf32, #tpu.memory_space<vmem>>, vector<16x16x128xf32>
    %cst_64 = arith.constant 0.0782501251 : f32
    %78 = vector.broadcast %cst_64 : f32 to vector<16x16x128xf32>
    %79 = arith.mulf %78, %77 : vector<16x16x128xf32>
    %80 = arith.addf %76, %79 : vector<16x16x128xf32>
    %c0_65 = arith.constant 0 : index
    %c0_66 = arith.constant 0 : index
    %c0_67 = arith.constant 0 : index
    %81 = vector.load %arg2[%c0_65, %c0_66, %c0_67] : memref<16x16x128xf32, #tpu.memory_space<vmem>>, vector<16x16x128xf32>
    tpu.vector_store %arg2[%c0_65, %c0_66, %c0_67], %80 {strides = array<i32>} : memref<16x16x128xf32, #tpu.memory_space<vmem>>, vector<16x16x128xf32>,
    return
  }
  func.func @transform_0(%arg0: i32) -> (i32, i32, i32) {
    %c0_i32 = arith.constant 0 : i32
    %c0_i32_0 = arith.constant 0 : i32
    %c0_i32_1 = arith.constant 0 : i32
    return %c0_i32, %c0_i32_0, %arg0 : i32, i32, i32
  }
  func.func @transform_1(%arg0: i32) -> (i32, i32, i32) {
    %c0_i32 = arith.constant 0 : i32
    %c0_i32_0 = arith.constant 0 : i32
    %c0_i32_1 = arith.constant 0 : i32
    return %c0_i32, %c0_i32_0, %arg0 : i32, i32, i32
  }
}

</mosaic_0001>

<bundles_post_ra>
// kernel: gaussian_blur.1
= control target key start
LH: loop header
LB: loop body
LE: loop exit
PB: predicated region body
PF: predicated region fallthrough
CT: control target
= control target key end

     0   :  { %s1761_s0 = inlined_call_operand.vmem [shape: f32[16,16,128], index: 0, kind: input, shape index: {}]   ;;  %s1762_s1 = inlined_call_operand.vmem [shape: f32[16,16,128], index: 1, kind: output, shape index: {}]  }
   0x1   :  { %v8_v0 = vld [vmem:[%s1761_s0] sm:$0xff]  ;;  %v1130_v1 = vld [vmem:[%s1761_s0 + $0x8] sm:$0xff]  ;;  %v10_v2 = vld [vmem:[%s1761_s0 + $0x10] sm:$0xff] }
   0x2   :  { %40 = vst [vmem:[#allocation2 + $0x2] sm:$0xff] %v8_v0  ;;  %72 = vst [vmem:[#allocation2] sm:$0x2] %v8_v0  ;;  %v1141_v3 = vld [vmem:[%s1761_s0 + $0x18] sm:$0xff]  ;;  %v12_v4 = vld [vmem:[%s1761_s0 + $0x20] sm:$0xff] }
   0x3   :  { %104 = vst [vmem:[#allocation2 - $0x2] sm:$0x4] %v8_v0  ;;  %41 = vst [vmem:[#allocation2 + $0xa] sm:$0xff] %v1130_v1  ;;  %v1149_v5 = vld [vmem:[%s1761_s0 + $0x28] sm:$0xff]  ;;  %v1160_v6 = vld [vmem:[%s1761_s0 + $0x30] sm:$0xff] }
   0x4   :  { %88 = vst [vmem:[#allocation2 + $0xc] sm:$0x40] %v1130_v1  ;;  %120 = vst [vmem:[#allocation2 + $0xe] sm:$0x20] %v1130_v1  ;;  %v1165_v7 = vld [vmem:[%s1761_s0 + $0x38] sm:$0xff]  ;;  %v1170_v8 = vld [vmem:[%s1761_s0 + $0x40] sm:$0xff] }
   0x5   :  { %42 = vst [vmem:[#allocation2 + $0x1a] sm:$0xff] %v10_v2  ;;  %73 = vst [vmem:[#allocation2 + $0x18] sm:$0x2] %v10_v2  ;;  %v1184_v9 = vld [vmem:[%s1761_s0 + $0x48] sm:$0xff]  ;;  %v1189_v10 = vld [vmem:[%s1761_s0 + $0x50] sm:$0xff] }
   0x6   :  { %105 = vst [vmem:[#allocation2 + $0x16] sm:$0x4] %v10_v2  ;;  %43 = vst [vmem:[#allocation2 + $0x22] sm:$0xff] %v1141_v3  ;;  %v1194_v11 = vld [vmem:[%s1761_s0 + $0x58] sm:$0xff]  ;;  %v1196_v12 = vmul.f32 0.36268348, %v8_v0 }
   0x7   :  { %89 = vst [vmem:[#allocation2 + $0x24] sm:$0x40] %v1141_v3  ;;  %121 = vst [vmem:[#allocation2 + $0x26] sm:$0x20] %v1141_v3  ;;  %v1210_v13 = vld [vmem:[%s1761_s0 + $0x60] sm:$0xff]  ;;  %v1215_v14 = vld [vmem:[%s1761_s0 + $0x68] sm:$0xff] }
   0x8   :  { %44 = vst [vmem:[#allocation2 + $0x32] sm:$0xff] %v12_v4  ;;  %74 = vst [vmem:[#allocation2 + $0x30] sm:$0x2] %v12_v4  ;;  %v1220_v15 = vld [vmem:[%s1761_s0 + $0x70] sm:$0xff]  ;;  %v1222_v16 = vmul.f32 0.36268348, %v10_v2 }
   0x9   :  { %106 = vst [vmem:[#allocation2 + $0x2e] sm:$0x4] %v12_v4  ;;  %45 = vst [vmem:[#allocation2 + $0x3a] sm:$0xff] %v1149_v5  ;;  %v1236_v17 = vld [vmem:[%s1761_s0 + $0x78] sm:$0xff]  ;;  %v1241_v18 = vld [vmem:[%s1761_s0 + $0x80] sm:$0xff] }
   0xa   :  { %90 = vst [vmem:[#allocation2 + $0x3c] sm:$0x40] %v1149_v5  ;;  %122 = vst [vmem:[#allocation2 + $0x3e] sm:$0x20] %v1149_v5  ;;  %v1246_v19 = vld [vmem:[%s1761_s0 + $0x88] sm:$0xff]  ;;  %v1262_v21 = vld [vmem:[%s1761_s0 + $0x90] sm:$0xff] }
   0xb   :  { %46 = vst [vmem:[#allocation2 + $0x4a] sm:$0xff] %v1160_v6  ;;  %75 = vst [vmem:[#allocation2 + $0x48] sm:$0x2] %v1160_v6  ;;  %v1248_v20 = vmul.f32 0.36268348, %v12_v4  ;;  %v1267_v22 = vld [vmem:[%s1761_s0 + $0x98] sm:$0xff] }
   0xc   :  { %107 = vst [vmem:[#allocation2 + $0x46] sm:$0x4] %v1160_v6  ;;  %47 = vst [vmem:[#allocation2 + $0x52] sm:$0xff] %v1165_v7  ;;  %v1272_v23 = vld [vmem:[%s1761_s0 + $0xa0] sm:$0xff]  ;;  %v1275_v24 = vmul.f32 0.36268348, %v1130_v1 }
   0xd   :  { %91 = vst [vmem:[#allocation2 + $0x54] sm:$0x40] %v1165_v7  ;;  %123 = vst [vmem:[#allocation2 + $0x56] sm:$0x20] %v1165_v7  ;;  %v1289_v25 = vld [vmem:[%s1761_s0 + $0xa8] sm:$0xff]  ;;  %v1294_v26 = vld [vmem:[%s1761_s0 + $0xb0] sm:$0xff] }
   0xe   :  { %48 = vst [vmem:[#allocation2 + $0x62] sm:$0xff] %v1170_v8  ;;  %76 = vst [vmem:[#allocation2 + $0x60] sm:$0x2] %v1170_v8  ;;  %v31_v27 = vld [vmem:[%s1761_s0 + $0xb8] sm:$0xff]  ;;  %v1300_v28 = vmul.f32 0.36268348, %v1141_v3 }
   0xf   :  { %108 = vst [vmem:[#allocation2 + $0x5e] sm:$0x4] %v1170_v8  ;;  %49 = vst [vmem:[#allocation2 + $0x6a] sm:$0xff] %v1184_v9  ;;  %v32_v29 = vld [vmem:[%s1761_s0 + $0xc0] sm:$0xff]  ;;  %v33_v30 = vld [vmem:[%s1761_s0 + $0xc8] sm:$0xff] }
  0x10   :  { %92 = vst [vmem:[#allocation2 + $0x6c] sm:$0x40] %v1184_v9  ;;  %124 = vst [vmem:[#allocation2 + $0x6e] sm:$0x20] %v1184_v9  ;;  %v34_v31 = vld [vmem:[%s1761_s0 + $0xd0] sm:$0xff]  ;;  %v35_v33 = vld [vmem:[%s1761_s0 + $0xd8] sm:$0xff] }
  0x11   :  { %50 = vst [vmem:[#allocation2 + $0x7a] sm:$0xff] %v1189_v10  ;;  %77 = vst [vmem:[#allocation2 + $0x78] sm:$0x2] %v1189_v10  ;;  %v1318_v32 = vmul.f32 0.36268348, %v1149_v5  ;;  %v36_v34 = vld [vmem:[%s1761_s0 + $0xe0] sm:$0xff] }
  0x12   :  { %109 = vst [vmem:[#allocation2 + $0x76] sm:$0x4] %v1189_v10  ;;  %51 = vst [vmem:[#allocation2 + $0x82] sm:$0xff] %v1194_v11  ;;  %v37_v35 = vld [vmem:[%s1761_s0 + $0xe8] sm:$0xff]  ;;  %v1330_v36 = vmul.f32 0.36268348, %v1160_v6 }
  0x13   :  { %93 = vst [vmem:[#allocation2 + $0x84] sm:$0x40] %v1194_v11  ;;  %125 = vst [vmem:[#allocation2 + $0x86] sm:$0x20] %v1194_v11  ;;  %v38_v37 = vld [vmem:[%s1761_s0 + $0xf0] sm:$0xff]  ;;  %v39_v38 = vld [vmem:[%s1761_s0 + $0xf8] sm:$0xff] }
  0x14   :  { %52 = vst [vmem:[#allocation2 + $0x92] sm:$0xff] %v1210_v13  ;;  %78 = vst [vmem:[#allocation2 + $0x90] sm:$0x2] %v1210_v13  ;;  %v136_v39 = vld [vmem:[#allocation2] sm:$0xff]  ;;  %v1339_v40 = vmul.f32 0.36268348, %v1170_v8 }
  0x15   :  { %110 = vst [vmem:[#allocation2 + $0x8e] sm:$0x4] %v1210_v13  ;;  %53 = vst [vmem:[#allocation2 + $0x9a] sm:$0xff] %v1215_v14  ;;  %v138_v41 = vld [vmem:[#allocation2 + $0x18] sm:$0xff]  ;;  %v140_v42 = vld [vmem:[#allocation2 + $0x30] sm:$0xff] }
  0x16   :  { %94 = vst [vmem:[#allocation2 + $0x9c] sm:$0x40] %v1215_v14  ;;  %126 = vst [vmem:[#allocation2 + $0x9e] sm:$0x20] %v1215_v14  ;;  %v168_v43 = vmul.f32 0.078250125, %v136_v39 }
  0x17   :  { %54 = vst [vmem:[#allocation2 + $0xaa] sm:$0xff] %v1220_v15  ;;  %79 = vst [vmem:[#allocation2 + $0xa8] sm:$0x2] %v1220_v15  ;;  %v200_v44 = vld [vmem:[#allocation2 + $0x1] sm:$0xff]  ;;  %v170_v45 = vmul.f32 0.078250125, %v138_v41 }
  0x18   :  { %111 = vst [vmem:[#allocation2 + $0xa6] sm:$0x4] %v1220_v15  ;;  %55 = vst [vmem:[#allocation2 + $0xb2] sm:$0xff] %v1236_v17  ;;  %v172_v46 = vmul.f32 0.078250125, %v140_v42  ;;  %v202_v47 = vld [vmem:[#allocation2 + $0x19] sm:$0xff] }
  0x19   :  { %95 = vst [vmem:[#allocation2 + $0xb4] sm:$0x40] %v1236_v17  ;;  %127 = vst [vmem:[#allocation2 + $0xb6] sm:$0x20] %v1236_v17  ;;  %v204_v48 = vld [vmem:[#allocation2 + $0x31] sm:$0xff]  ;;  %v392_v52 = vld [vmem:[#allocation2 + $0x3] sm:$0xff] }
  0x1a   :  { %56 = vst [vmem:[#allocation2 + $0xc2] sm:$0xff] %v1241_v18  ;;  %80 = vst [vmem:[#allocation2 + $0xc0] sm:$0x2] %v1241_v18  ;;  %v232_v49 = vmul.f32 0.24040814, %v200_v44  ;;  %v394_v53 = vld [vmem:[#allocation2 + $0x1b] sm:$0xff] }
  0x1b   :  { %112 = vst [vmem:[#allocation2 + $0xbe] sm:$0x4] %v1241_v18  ;;  %57 = vst [vmem:[#allocation2 + $0xca] sm:$0xff] %v1246_v19  ;;  %v234_v50 = vmul.f32 0.24040814, %v202_v47  ;;  %v396_v54 = vld [vmem:[#allocation2 + $0x33] sm:$0xff] }
  0x1c   :  { %96 = vst [vmem:[#allocation2 + $0xcc] sm:$0x40] %v1246_v19  ;;  %128 = vst [vmem:[#allocation2 + $0xce] sm:$0x20] %v1246_v19  ;;  %v236_v51 = vmul.f32 0.24040814, %v204_v48  ;;  %v264_v56 = vadd.f32 %v232_v49, %v168_v43 }
  0x1d   :  { %58 = vst [vmem:[#allocation2 + $0xda] sm:$0xff] %v1262_v21  ;;  %81 = vst [vmem:[#allocation2 + $0xd8] sm:$0x2] %v1262_v21  ;;  %v1342_v55 = vmul.f32 0.36268348, %v1165_v7  ;;  %v266_v57 = vadd.f32 %v234_v50, %v170_v45  ;;  %v488_v60 = vld [vmem:[#allocation2 + $0x4] sm:$0xff] }
  0x1e   :  { %113 = vst [vmem:[#allocation2 + $0xd6] sm:$0x4] %v1262_v21  ;;  %59 = vst [vmem:[#allocation2 + $0xe2] sm:$0xff] %v1267_v22  ;;  %v268_v58 = vadd.f32 %v236_v51, %v172_v46  ;;  %v424_v59 = vmul.f32 0.24040814, %v392_v52  ;;  %v490_v61 = vld [vmem:[#allocation2 + $0x1c] sm:$0xff]  ;;  %v360_v2 = vadd.f32 %v1196_v12, %v264_v56 }
  0x1f   :  { %97 = vst [vmem:[#allocation2 + $0xe4] sm:$0x40] %v1267_v22  ;;  %129 = vst [vmem:[#allocation2 + $0xe6] sm:$0x20] %v1267_v22  ;;  %v492_v62 = vld [vmem:[#allocation2 + $0x34] sm:$0xff]  ;;  %v362_v3 = vadd.f32 %v1222_v16, %v266_v57  ;;  %v137_v6 = vld [vmem:[#allocation2 + $0x8] sm:$0xff] }
  0x20   :  { %60 = vst [vmem:[#allocation2 + $0xf2] sm:$0xff] %v1272_v23  ;;  %82 = vst [vmem:[#allocation2 + $0xf0] sm:$0x2] %v1272_v23  ;;  %v426_v63 = vmul.f32 0.24040814, %v394_v53  ;;  %v364_v4 = vadd.f32 %v1248_v20, %v268_v58  ;;  %v139_v7 = vld [vmem:[#allocation2 + $0x20] sm:$0xff] }
  0x21   :  { %114 = vst [vmem:[#allocation2 + $0xee] sm:$0x4] %v1272_v23  ;;  %61 = vst [vmem:[#allocation2 + $0xfa] sm:$0xff] %v1289_v25  ;;  %v428_v0 = vmul.f32 0.24040814, %v396_v54  ;;  %v141_v8 = vld [vmem:[#allocation2 + $0x38] sm:$0xff] }
  0x22   :  { %98 = vst [vmem:[#allocation2 + $0xfc] sm:$0x40] %v1289_v25  ;;  %130 = vst [vmem:[#allocation2 + $0xfe] sm:$0x20] %v1289_v25  ;;  %v520_v1 = vmul.f32 0.078250125, %v488_v60 }
  0x23   :  { %62 = vst [vmem:[#allocation2 + $0x10a] sm:$0xff] %v1294_v26  ;;  %83 = vst [vmem:[#allocation2 + $0x108] sm:$0x2] %v1294_v26  ;;  %v522_v5 = vmul.f32 0.078250125, %v490_v61  ;;  %v205_v39 = vld [vmem:[#allocation2 + $0x39] sm:$0xff] }
  0x24   :  { %115 = vst [vmem:[#allocation2 + $0x106] sm:$0x4] %v1294_v26  ;;  %63 = vst [vmem:[#allocation2 + $0x112] sm:$0xff] %v31_v27  ;;  %v237_v42 = vmul.f32 0.24040814, %v205_v39  ;;  %v393_v44 = vld [vmem:[#allocation2 + $0xb] sm:$0xff] }
  0x25   :  { %99 = vst [vmem:[#allocation2 + $0x114] sm:$0x40] %v31_v27  ;;  %131 = vst [vmem:[#allocation2 + $0x116] sm:$0x20] %v31_v27  ;;  %v524_v27 = vmul.f32 0.078250125, %v492_v62 }
  0x26   :  { %64 = vst [vmem:[#allocation2 + $0x122] sm:$0xff] %v32_v29  ;;  %84 = vst [vmem:[#allocation2 + $0x120] sm:$0x2] %v32_v29  ;;  %v395_v45 = vld [vmem:[#allocation2 + $0x23] sm:$0xff]  ;;  %v397_v46 = vld [vmem:[#allocation2 + $0x3b] sm:$0xff] }
  0x27   :  { %116 = vst [vmem:[#allocation2 + $0x11e] sm:$0x4] %v32_v29  ;;  %65 = vst [vmem:[#allocation2 + $0x12a] sm:$0xff] %v33_v30  ;;  %v169_v29 = vmul.f32 0.078250125, %v137_v6  ;;  %v489_v52 = vld [vmem:[#allocation2 + $0xc] sm:$0xff] }
  0x28   :  { %100 = vst [vmem:[#allocation2 + $0x12c] sm:$0x40] %v33_v30  ;;  %132 = vst [vmem:[#allocation2 + $0x12e] sm:$0x20] %v33_v30  ;;  %v171_v30 = vmul.f32 0.078250125, %v139_v7 }
  0x29   :  { %66 = vst [vmem:[#allocation2 + $0x13a] sm:$0xff] %v34_v31  ;;  %85 = vst [vmem:[#allocation2 + $0x138] sm:$0x2] %v34_v31  ;;  %v1354_v47 = vmul.f32 0.36268348, %v1184_v9  ;;  %v491_v53 = vld [vmem:[#allocation2 + $0x24] sm:$0xff] }
  0x2a   :  { %117 = vst [vmem:[#allocation2 + $0x136] sm:$0x4] %v34_v31  ;;  %67 = vst [vmem:[#allocation2 + $0x142] sm:$0xff] %v35_v33  ;;  %v456_v31 = vadd.f32 %v424_v59, %v360_v2  ;;  %v425_v51 = vmul.f32 0.24040814, %v393_v44  ;;  %v493_v54 = vld [vmem:[#allocation2 + $0x3c] sm:$0xff] }
  0x2b   :  { %101 = vst [vmem:[#allocation2 + $0x144] sm:$0x40] %v35_v33  ;;  %133 = vst [vmem:[#allocation2 + $0x146] sm:$0x20] %v35_v33  ;;  %v458_v33 = vadd.f32 %v426_v63, %v362_v3  ;;  %v427_v61 = vmul.f32 0.24040814, %v395_v45 }
  0x2c   :  { %68 = vst [vmem:[#allocation2 + $0x152] sm:$0xff] %v36_v34  ;;  %86 = vst [vmem:[#allocation2 + $0x150] sm:$0x2] %v36_v34  ;;  %v1347_v16 = vadd.f32 %v520_v1, %v456_v31  ;;  %v142_v62 = vld [vmem:[#allocation2 + $0x48] sm:$0xff]  ;;  %v144_v63 = vld [vmem:[#allocation2 + $0x60] sm:$0xff] }
  0x2d   :  { %118 = vst [vmem:[#allocation2 + $0x14e] sm:$0x4] %v36_v34  ;;  %69 = vst [vmem:[#allocation2 + $0x15a] sm:$0xff] %v37_v35  ;;  %v460_v34 = vadd.f32 %v428_v0, %v364_v4  ;;  %v1349_v20 = vadd.f32 %v522_v5, %v458_v33  ;;  %v206_v0 = vld [vmem:[#allocation2 + $0x49] sm:$0xff]  ;;  %v429_v2 = vmul.f32 0.24040814, %v397_v46 }
  0x2e   :  { %102 = vst [vmem:[#allocation2 + $0x15c] sm:$0x40] %v37_v35  ;;  %134 = vst [vmem:[#allocation2 + $0x15e] sm:$0x20] %v37_v35  ;;  %v173_v35 = vmul.f32 0.078250125, %v141_v8 }
  0x2f   :  { %70 = vst [vmem:[#allocation2 + $0x16a] sm:$0xff] %v38_v37  ;;  %87 = vst [vmem:[#allocation2 + $0x168] sm:$0x2] %v38_v37  ;;  %v1351_v43 = vadd.f32 %v524_v27, %v460_v34  ;;  %v1360_v57 = vmul.f32 0.24040814, %v1349_v20  ;;  %v208_v27 = vld [vmem:[#allocation2 + $0x61] sm:$0xff] }
  0x30   :  { %119 = vst [vmem:[#allocation2 + $0x166] sm:$0x4] %v38_v37  ;;  %71 = vst [vmem:[#allocation2 + $0x172] sm:$0xff] %v39_v38  ;;  %v201_v37 = vld [vmem:[#allocation2 + $0x9] sm:$0xff]  ;;  %v269_v50 = vadd.f32 %v237_v42, %v173_v35  ;;  %v820_v58 = vmul.f32 0.36268348, %v1347_v16 }
  0x31   :  { %103 = vst [vmem:[#allocation2 + $0x174] sm:$0x40] %v39_v38  ;;  %135 = vst [vmem:[#allocation2 + $0x176] sm:$0x20] %v39_v38  ;;  %v203_v38 = vld [vmem:[#allocation2 + $0x21] sm:$0xff] }
  0x32   :  { %v233_v41 = vmul.f32 0.24040814, %v201_v37  ;;  %v235_v12 = vmul.f32 0.24040814, %v203_v38  ;;  %v1357_v56 = vmul.f32 0.078250125, %v1351_v43  ;;  %v365_v60 = vadd.f32 %v1318_v32, %v269_v50 }
  0x33   :  { %v521_v3 = vmul.f32 0.078250125, %v489_v52  ;;  %v523_v4 = vmul.f32 0.078250125, %v491_v53  ;;  %v525_v7 = vmul.f32 0.078250125, %v493_v54 }
  0x34   :  { %v265_v48 = vadd.f32 %v233_v41, %v169_v29  ;;  %v267_v49 = vadd.f32 %v235_v12, %v171_v30  ;;  %v756_v1 = vadd.f32 %v1360_v57, %v1357_v56  ;;  %v174_v8 = vmul.f32 0.078250125, %v142_v62  ;;  %v400_v31 = vld [vmem:[#allocation2 + $0x63] sm:$0xff]  ;;  %v494_v38 = vld [vmem:[#allocation2 + $0x4c] sm:$0xff] }
  0x35   :  { %v176_v30 = vmul.f32 0.078250125, %v144_v63  ;;  %v238_v32 = vmul.f32 0.24040814, %v206_v0  ;;  %v240_v35 = vmul.f32 0.24040814, %v208_v27 }
  0x36   :  { %v361_v59 = vadd.f32 %v1275_v24, %v265_v48  ;;  %v363_v9 = vadd.f32 %v1300_v28, %v267_v49  ;;  %v398_v24 = vld [vmem:[#allocation2 + $0x4b] sm:$0xff]  ;;  %v852_v29 = vadd.f32 %v820_v58, %v756_v1  ;;  %v461_v28 = vadd.f32 %v429_v2, %v365_v60 }
  0x37   :  { %v430_v37 = vmul.f32 0.24040814, %v398_v24  ;;  %v270_v12 = vadd.f32 %v238_v32, %v174_v8  ;;  %v432_v42 = vmul.f32 0.24040814, %v400_v31  ;;  %v496_v44 = vld [vmem:[#allocation2 + $0x64] sm:$0xff]  ;;  %v272_v48 = vadd.f32 %v240_v35, %v176_v30  ;;  %v143_v49 = vld [vmem:[#allocation2 + $0x50] sm:$0xff] }
  0x38   :  { %v457_v5 = vadd.f32 %v425_v51, %v361_v59  ;;  %v459_v6 = vadd.f32 %v427_v61, %v363_v9  ;;  %v949_v39 = vadd.f32 %v852_v29, %v1360_v57  ;;  %v1373_v41 = vadd.f32 %v525_v7, %v461_v28  ;;  %v145_v50 = vld [vmem:[#allocation2 + $0x68] sm:$0xff]  ;;  %v207_v58 = vld [vmem:[#allocation2 + $0x51] sm:$0xff] }
  0x39   :  { %v366_v53 = vadd.f32 %v1330_v36, %v270_v12  ;;  %v526_v54 = vmul.f32 0.078250125, %v494_v38  ;;  %v209_v59 = vld [vmem:[#allocation2 + $0x69] sm:$0xff]  ;;  %v368_v9 = vadd.f32 %v1339_v40, %v272_v48  ;;  %v528_v60 = vmul.f32 0.078250125, %v496_v44  ;;  %v495_v38 = vld [vmem:[#allocation2 + $0x54] sm:$0xff] }
  0x3a   :  { %v1368_v33 = vadd.f32 %v521_v3, %v457_v5  ;;  %v1370_v34 = vadd.f32 %v523_v4, %v459_v6  ;;  %v1046_v51 = vadd.f32 %v949_v39, %v1357_v56  ;;  %v1381_v52 = vmul.f32 0.078250125, %v1373_v41  ;;  %v399_v5 = vld [vmem:[#allocation2 + $0x53] sm:$0xff]  ;;  %v401_v6 = vld [vmem:[#allocation2 + $0x6b] sm:$0xff] }
  0x3b   :  { %v1386_v61 = vmul.f32 0.078250125, %v1349_v20  ;;  %v726_v62 = vmul.f32 0.24040814, %v1347_v16  ;;  %v462_v0 = vadd.f32 %v430_v37, %v366_v53  ;;  %v822_v36 = vmul.f32 0.36268348, %v1349_v20 }
  0x3c   :  { %v1376_v45 = vmul.f32 0.24040814, %v1370_v34  ;;  %v821_v46 = vmul.f32 0.36268348, %v1368_v33  ;;  %1078 = vst [vmem:[%s1762_s1] sm:$0xff] %v1046_v51  ;;  %v175_v1 = vmul.f32 0.078250125, %v143_v49  ;;  %v464_v2 = vadd.f32 %v432_v42, %v368_v9 }
  0x3d   :  { %v758_v40 = vadd.f32 %v726_v62, %v1386_v61  ;;  %v177_v3 = vmul.f32 0.078250125, %v145_v50  ;;  %v239_v4 = vmul.f32 0.24040814, %v207_v58  ;;  %v1396_v8 = vadd.f32 %v526_v54, %v462_v0  ;;  %v146_v44 = vld [vmem:[#allocation2 + $0x78] sm:$0xff]  ;;  %v497_v49 = vld [vmem:[#allocation2 + $0x6c] sm:$0xff] }
  0x3e   :  { %v757_v63 = vadd.f32 %v1376_v45, %v1381_v52  ;;  %v241_v27 = vmul.f32 0.24040814, %v209_v59  ;;  %v338_v24 = vmul.f32 0.36268348, %v1189_v10  ;;  %v1399_v29 = vadd.f32 %v528_v60, %v464_v2  ;;  %v210_v53 = vld [vmem:[#allocation2 + $0x79] sm:$0xff] }
  0x3f   :  { %v1402_v28 = vmul.f32 0.24040814, %v1351_v43  ;;  %v854_v20 = vadd.f32 %v822_v36, %v758_v40  ;;  %v271_v30 = vadd.f32 %v239_v4, %v175_v1  ;;  %v431_v35 = vmul.f32 0.24040814, %v399_v5  ;;  %v498_v4 = vld [vmem:[#allocation2 + $0x7c] sm:$0xff] }
  0x40   :  { %v853_v7 = vadd.f32 %v821_v46, %v757_v63  ;;  %v273_v31 = vadd.f32 %v241_v27, %v177_v3  ;;  %v433_v37 = vmul.f32 0.24040814, %v401_v6  ;;  %v670_v39 = vmul.f32 0.078250125, %v1396_v8  ;;  %v402_v63 = vld [vmem:[#allocation2 + $0x7b] sm:$0xff] }
  0x41   :  { %v1407_v12 = vmul.f32 0.24040814, %v1399_v29  ;;  %v951_v10 = vadd.f32 %v854_v20, %v1402_v28  ;;  %v367_v42 = vadd.f32 %v1342_v55, %v271_v30  ;;  %v1414_v50 = vmul.f32 0.078250125, %v1370_v34  ;;  %v211_v5 = vld [vmem:[#allocation2 + $0x81] sm:$0xff] }
  0x42   :  { %v950_v32 = vadd.f32 %v853_v7, %v1376_v45  ;;  %v369_v48 = vadd.f32 %v1354_v47, %v273_v31  ;;  %v727_v51 = vmul.f32 0.24040814, %v1368_v33  ;;  %v527_v59 = vmul.f32 0.078250125, %v495_v38  ;;  %v148_v38 = vld [vmem:[#allocation2 + $0x90] sm:$0xff] }
  0x43   :  { %v1048_v54 = vadd.f32 %v951_v10, %v670_v39  ;;  %v463_v58 = vadd.f32 %v431_v35, %v367_v42  ;;  %v339_v9 = vmul.f32 0.36268348, %v1194_v11  ;;  %v823_v47 = vmul.f32 0.36268348, %v1370_v34  ;;  %v147_v11 = vld [vmem:[#allocation2 + $0x80] sm:$0xff] }
  0x44   :  { %v1047_v46 = vadd.f32 %v950_v32, %v1381_v52  ;;  %v465_v55 = vadd.f32 %v433_v37, %v369_v48  ;;  %v759_v60 = vadd.f32 %v727_v51, %v1414_v50  ;;  %v178_v62 = vmul.f32 0.078250125, %v146_v44  ;;  %v403_v37 = vld [vmem:[#allocation2 + $0x83] sm:$0xff]  ;;  %v212_v51 = vld [vmem:[#allocation2 + $0x91] sm:$0xff] }
  0x45   :  { %1080 = vst [vmem:[%s1762_s1 + $0x10] sm:$0xff] %v1048_v54  ;;  %v529_v0 = vmul.f32 0.078250125, %v497_v49  ;;  %v1426_v36 = vadd.f32 %v527_v59, %v463_v58  ;;  %v242_v1 = vmul.f32 0.24040814, %v210_v53  ;;  %v1429_v2 = vadd.f32 %v1407_v12, %v670_v39  ;;  %v499_v58 = vld [vmem:[#allocation2 + $0x84] sm:$0xff] }
  0x46   :  { %1079 = vst [vmem:[%s1762_s1 + $0x8] sm:$0xff] %v1047_v46  ;;  %v1432_v40 = vmul.f32 0.24040814, %v1373_v41  ;;  %v855_v3 = vadd.f32 %v823_v47, %v759_v60  ;;  %v664_v34 = vmul.f32 0.078250125, %v1347_v16 }
  0x47   :  { %v1435_v6 = vadd.f32 %v529_v0, %v465_v55  ;;  %v671_v7 = vmul.f32 0.078250125, %v1426_v36  ;;  %v274_v27 = vadd.f32 %v242_v1, %v178_v62  ;;  %v434_v20 = vmul.f32 0.24040814, %v402_v63  ;;  %v149_v0 = vld [vmem:[#allocation2 + $0x98] sm:$0xff] }
  0x48   :  { %v952_v30 = vadd.f32 %v855_v3, %v1432_v40  ;;  %v760_v32 = vadd.f32 %v1360_v57, %v664_v34  ;;  %v824_v31 = vmul.f32 0.36268348, %v1351_v43  ;;  %v179_v35 = vmul.f32 0.078250125, %v147_v11  ;;  %v404_v34 = vld [vmem:[#allocation2 + $0x93] sm:$0xff] }
  0x49   :  { %v370_v39 = vadd.f32 %v338_v24, %v274_v27  ;;  %v530_v10 = vmul.f32 0.078250125, %v498_v4  ;;  %v672_v16 = vmul.f32 0.078250125, %v1399_v29  ;;  %v243_v42 = vmul.f32 0.24040814, %v211_v5 }
  0x4a   :  { %v1049_v44 = vadd.f32 %v952_v30, %v671_v7  ;;  %v1443_v46 = vmul.f32 0.24040814, %v1396_v8  ;;  %v856_v48 = vadd.f32 %v824_v31, %v760_v32  ;;  %v665_v49 = vmul.f32 0.078250125, %v1368_v33  ;;  %v213_v5 = vld [vmem:[#allocation2 + $0x99] sm:$0xff] }
  0x4b   :  { %v1447_v57 = vmul.f32 0.24040814, %v1435_v6  ;;  %v466_v43 = vadd.f32 %v434_v20, %v370_v39  ;;  %v275_v53 = vadd.f32 %v243_v42, %v179_v35  ;;  %v435_v54 = vmul.f32 0.24040814, %v403_v37 }
  0x4c   :  { %1081 = vst [vmem:[%s1762_s1 + $0x18] sm:$0xff] %v1049_v44  ;;  %v953_v24 = vadd.f32 %v856_v48, %v1443_v46  ;;  %v761_v59 = vadd.f32 %v1376_v45, %v665_v49  ;;  %v825_v55 = vmul.f32 0.36268348, %v1373_v41  ;;  %v180_v60 = vmul.f32 0.078250125, %v148_v38  ;;  %v405_v49 = vld [vmem:[#allocation2 + $0x9b] sm:$0xff] }
  0x4d   :  { %v1455_v33 = vadd.f32 %v530_v10, %v466_v43  ;;  %v371_v47 = vadd.f32 %v339_v9, %v275_v53  ;;  %v244_v62 = vmul.f32 0.24040814, %v212_v51  ;;  %v340_v63 = vmul.f32 0.36268348, %v1210_v13  ;;  %v500_v9 = vld [vmem:[#allocation2 + $0x94] sm:$0xff]  ;;  %v150_v51 = vld [vmem:[#allocation2 + $0xa8] sm:$0xff] }
  0x4e   :  { %v1050_v1 = vadd.f32 %v953_v24, %v672_v16  ;;  %v531_v11 = vmul.f32 0.078250125, %v499_v58  ;;  %v1459_v3 = vmul.f32 0.24040814, %v1426_v36  ;;  %v857_v4 = vadd.f32 %v825_v55, %v761_v59  ;;  %v501_v58 = vld [vmem:[#allocation2 + $0x9c] sm:$0xff] }
  0x4f   :  { %v1462_v45 = vmul.f32 0.24040814, %v1455_v33  ;;  %v467_v41 = vadd.f32 %v435_v54, %v371_v47  ;;  %v673_v27 = vmul.f32 0.078250125, %v1435_v6  ;;  %v276_v20 = vadd.f32 %v244_v62, %v180_v60  ;;  %v406_v62 = vld [vmem:[#allocation2 + $0xab] sm:$0xff] }
  0x50   :  { %1082 = vst [vmem:[%s1762_s1 + $0x20] sm:$0xff] %v1050_v1  ;;  %v954_v13 = vadd.f32 %v857_v4, %v1459_v3  ;;  %v762_v30 = vadd.f32 %v1402_v28, %v1386_v61  ;;  %v826_v32 = vmul.f32 0.36268348, %v1396_v8  ;;  %v181_v31 = vmul.f32 0.078250125, %v149_v0  ;;  %v214_v28 = vld [vmem:[#allocation2 + $0xa9] sm:$0xff] }
  0x51   :  { %v1473_v35 = vadd.f32 %v1447_v57, %v671_v7  ;;  %v372_v37 = vadd.f32 %v340_v63, %v276_v20  ;;  %v436_v38 = vmul.f32 0.24040814, %v404_v34  ;;  %v245_v39 = vmul.f32 0.24040814, %v213_v5  ;;  %v215_v4 = vld [vmem:[#allocation2 + $0xb1] sm:$0xff] }
  0x52   :  { %v1051_v10 = vadd.f32 %v954_v13, %v673_v27  ;;  %v532_v42 = vmul.f32 0.078250125, %v500_v9  ;;  %v858_v44 = vadd.f32 %v826_v32, %v762_v30  ;;  %v341_v48 = vmul.f32 0.36268348, %v1215_v14  ;;  %v502_v20 = vld [vmem:[#allocation2 + $0xac] sm:$0xff] }
  0x53   :  { %v1476_v43 = vadd.f32 %v531_v11, %v467_v41  ;;  %v468_v53 = vadd.f32 %v436_v38, %v372_v37  ;;  %v674_v61 = vmul.f32 0.078250125, %v1455_v33  ;;  %v277_v8 = vadd.f32 %v245_v39, %v181_v31  ;;  %v151_v11 = vld [vmem:[#allocation2 + $0xb0] sm:$0xff] }
  0x54   :  { %v1480_v7 = vadd.f32 %v1462_v45, %v672_v16  ;;  %1083 = vst [vmem:[%s1762_s1 + $0x28] sm:$0xff] %v1051_v10  ;;  %v955_v54 = vadd.f32 %v858_v44, %v1407_v12  ;;  %v763_v14 = vadd.f32 %v1432_v40, %v1414_v50  ;;  %v827_v24 = vmul.f32 0.36268348, %v1426_v36  ;;  %v152_v10 = vld [vmem:[#allocation2 + $0xc0] sm:$0xff] }
  0x55   :  { %v1489_v59 = vadd.f32 %v532_v42, %v468_v53  ;;  %v373_v55 = vadd.f32 %v341_v48, %v277_v8  ;;  %v437_v60 = vmul.f32 0.24040814, %v405_v49  ;;  %v182_v47 = vmul.f32 0.078250125, %v150_v51 }
  0x56   :  { %v1052_v16 = vadd.f32 %v955_v54, %v674_v61  ;;  %v859_v63 = vadd.f32 %v827_v24, %v763_v14  ;;  %v246_v0 = vmul.f32 0.24040814, %v214_v28  ;;  %v342_v1 = vmul.f32 0.36268348, %v1220_v15  ;;  %v217_v14 = vld [vmem:[#allocation2 + $0xc9] sm:$0xff] }
  0x57   :  { %v737_v12 = vmul.f32 0.24040814, %v1476_v43  ;;  %v469_v34 = vadd.f32 %v437_v60, %v373_v55  ;;  %v533_v5 = vmul.f32 0.078250125, %v501_v58  ;;  %v675_v50 = vmul.f32 0.078250125, %v1476_v43 }
  0x58   :  { %v1495_v36 = vmul.f32 0.24040814, %v1489_v59  ;;  %1084 = vst [vmem:[%s1762_s1 + $0x30] sm:$0xff] %v1052_v16  ;;  %v956_v40 = vadd.f32 %v859_v63, %v1447_v57  ;;  %v278_v41 = vadd.f32 %v246_v0, %v182_v47  ;;  %v764_v15 = vadd.f32 %v1443_v46, %v1357_v56  ;;  %v407_v56 = vld [vmem:[#allocation2 + $0xb3] sm:$0xff]  ;;  %v216_v46 = vld [vmem:[#allocation2 + $0xc1] sm:$0xff] }
  0x59   :  { %v1503_v9 = vadd.f32 %v533_v5, %v469_v34  ;;  %v438_v13 = vmul.f32 0.24040814, %v406_v62  ;;  %v828_v30 = vmul.f32 0.36268348, %v1399_v29  ;;  %v183_v32 = vmul.f32 0.078250125, %v151_v11 }
  0x5a   :  { %v1053_v31 = vadd.f32 %v956_v40, %v675_v50  ;;  %v374_v37 = vadd.f32 %v342_v1, %v278_v41  ;;  %v247_v38 = vmul.f32 0.24040814, %v215_v4  ;;  %v343_v39 = vmul.f32 0.36268348, %v1236_v17  ;;  %v503_v17 = vld [vmem:[#allocation2 + $0xb4] sm:$0xff]  ;;  %v153_v58 = vld [vmem:[#allocation2 + $0xc8] sm:$0xff] }
  0x5b   :  { %v1507_v42 = vadd.f32 %v737_v12, %v673_v27  ;;  %v534_v57 = vmul.f32 0.078250125, %v502_v20  ;;  %v1510_v44 = vmul.f32 0.078250125, %v1489_v59  ;;  %v860_v48 = vadd.f32 %v828_v30, %v764_v15  ;;  %v504_v1 = vld [vmem:[#allocation2 + $0xc4] sm:$0xff]  ;;  %v154_v15 = vld [vmem:[#allocation2 + $0xd8] sm:$0xff] }
  0x5c   :  { %v1513_v49 = vmul.f32 0.24040814, %v1503_v9  ;;  %1085 = vst [vmem:[%s1762_s1 + $0x38] sm:$0xff] %v1053_v31  ;;  %v470_v29 = vadd.f32 %v438_v13, %v374_v37  ;;  %v279_v51 = vadd.f32 %v247_v38, %v183_v32  ;;  %v765_v27 = vadd.f32 %v1459_v3, %v1381_v52  ;;  %v409_v11 = vld [vmem:[#allocation2 + $0xcb] sm:$0xff]  ;;  %v218_v38 = vld [vmem:[#allocation2 + $0xd9] sm:$0xff] }
  0x5d   :  { %v1521_v53 = vadd.f32 %v1495_v36, %v674_v61  ;;  %v957_v8 = vadd.f32 %v860_v48, %v1462_v45  ;;  %v829_v28 = vmul.f32 0.36268348, %v1435_v6  ;;  %v184_v54 = vmul.f32 0.078250125, %v152_v10  ;;  %v408_v61 = vld [vmem:[#allocation2 + $0xc3] sm:$0xff]  ;;  %v505_v37 = vld [vmem:[#allocation2 + $0xcc] sm:$0xff] }
  0x5e   :  { %v375_v24 = vadd.f32 %v343_v39, %v279_v51  ;;  %v439_v55 = vmul.f32 0.24040814, %v407_v56  ;;  %v248_v60 = vmul.f32 0.24040814, %v216_v46  ;;  %v344_v47 = vmul.f32 0.36268348, %v1241_v18 }
  0x5f   :  { %v1054_v62 = vadd.f32 %v957_v8, %v1510_v44  ;;  %v535_v16 = vmul.f32 0.078250125, %v503_v17  ;;  %v677_v52 = vmul.f32 0.078250125, %v1503_v9  ;;  %v861_v3 = vadd.f32 %v829_v28, %v765_v27 }
  0x60   :  { %v1529_v63 = vadd.f32 %v1513_v49, %v675_v50  ;;  %v1531_v45 = vadd.f32 %v534_v57, %v470_v29  ;;  %v471_v6 = vadd.f32 %v439_v55, %v375_v24  ;;  %v280_v0 = vadd.f32 %v248_v60, %v184_v54  ;;  %v506_v60 = vld [vmem:[#allocation2 + $0xdc] sm:$0xff] }
  0x61   :  { %1086 = vst [vmem:[%s1762_s1 + $0x40] sm:$0xff] %v1054_v62  ;;  %v958_v18 = vadd.f32 %v861_v3, %v737_v12  ;;  %v830_v4 = vmul.f32 0.36268348, %v1455_v33  ;;  %v185_v34 = vmul.f32 0.078250125, %v153_v58  ;;  %v410_v58 = vld [vmem:[#allocation2 + $0xdb] sm:$0xff] }
  0x62   :  { %v249_v5 = vmul.f32 0.24040814, %v217_v14  ;;  %v1537_v40 = vadd.f32 %v535_v16, %v471_v6  ;;  %v376_v41 = vadd.f32 %v344_v47, %v280_v0  ;;  %v440_v50 = vmul.f32 0.24040814, %v408_v61  ;;  %v219_v14 = vld [vmem:[#allocation2 + $0xe1] sm:$0xff] }
  0x63   :  { %v345_v20 = vmul.f32 0.36268348, %v1246_v19  ;;  %v1055_v13 = vadd.f32 %v958_v18, %v677_v52  ;;  %v536_v30 = vmul.f32 0.078250125, %v504_v1  ;;  %v862_v32 = vadd.f32 %v830_v4, %v1429_v2  ;;  %v155_v2 = vld [vmem:[#allocation2 + $0xe0] sm:$0xff] }
  0x64   :  { %v281_v31 = vadd.f32 %v249_v5, %v185_v34  ;;  %v740_v12 = vmul.f32 0.24040814, %v1531_v45  ;;  %v472_v39 = vadd.f32 %v440_v50, %v376_v41  ;;  %v678_v33 = vmul.f32 0.078250125, %v1531_v45  ;;  %v411_v4 = vld [vmem:[#allocation2 + $0xe3] sm:$0xff]  ;;  %v220_v34 = vld [vmem:[#allocation2 + $0xf1] sm:$0xff] }
  0x65   :  { %v441_v10 = vmul.f32 0.24040814, %v409_v11  ;;  %1087 = vst [vmem:[%s1762_s1 + $0x48] sm:$0xff] %v1055_v13  ;;  %v959_v19 = vadd.f32 %v862_v32, %v1495_v36  ;;  %v831_v48 = vmul.f32 0.36268348, %v1476_v43  ;;  %v507_v50 = vld [vmem:[#allocation2 + $0xe4] sm:$0xff] }
  0x66   :  { %v377_v57 = vadd.f32 %v345_v20, %v281_v31  ;;  %v186_v56 = vmul.f32 0.078250125, %v154_v15  ;;  %v741_v46 = vmul.f32 0.24040814, %v1537_v40  ;;  %v1549_v29 = vadd.f32 %v536_v30, %v472_v39  ;;  %v157_v15 = vld [vmem:[#allocation2 + $0xf8] sm:$0xff] }
  0x67   :  { %v250_v51 = vmul.f32 0.24040814, %v218_v38  ;;  %v346_v17 = vmul.f32 0.36268348, %v1262_v21  ;;  %v1056_v27 = vadd.f32 %v959_v19, %v678_v33  ;;  %v537_v28 = vmul.f32 0.078250125, %v505_v37 }
  0x68   :  { %v473_v8 = vadd.f32 %v441_v10, %v377_v57  ;;  %v863_v54 = vadd.f32 %v831_v48, %v1473_v35  ;;  %v1554_v36 = vadd.f32 %v740_v12, %v1510_v44  ;;  %v1557_v43 = vmul.f32 0.24040814, %v1549_v29  ;;  %v156_v44 = vld [vmem:[#allocation2 + $0xf0] sm:$0xff]  ;;  %v221_v13 = vld [vmem:[#allocation2 + $0xf9] sm:$0xff] }
  0x69   :  { %v679_v24 = vmul.f32 0.078250125, %v1537_v40  ;;  %v282_v55 = vadd.f32 %v250_v51, %v186_v56  ;;  %1088 = vst [vmem:[%s1762_s1 + $0x50] sm:$0xff] %v1056_v27  ;;  %v832_v47 = vmul.f32 0.36268348, %v1489_v59  ;;  %v1568_v0 = vadd.f32 %v741_v46, %v677_v52  ;;  %v412_v19 = vld [vmem:[#allocation2 + $0xf3] sm:$0xff] }
  0x6a   :  { %v1563_v21 = vadd.f32 %v537_v28, %v473_v8  ;;  %v960_v35 = vadd.f32 %v863_v54, %v1513_v49  ;;  %v187_v62 = vmul.f32 0.078250125, %v155_v2  ;;  %v442_v3 = vmul.f32 0.24040814, %v410_v58  ;;  %v508_v56 = vld [vmem:[#allocation2 + $0xf4] sm:$0xff]  ;;  %v158_v58 = vld [vmem:[#allocation2 + $0x108] sm:$0xff] }
  0x6b   :  { %v378_v16 = vadd.f32 %v346_v17, %v282_v55  ;;  %v251_v61 = vmul.f32 0.24040814, %v219_v14  ;;  %v347_v6 = vmul.f32 0.36268348, %v1267_v22  ;;  %v538_v11 = vmul.f32 0.078250125, %v506_v60 }
  0x6c   :  { %v1057_v1 = vadd.f32 %v960_v35, %v679_v24  ;;  %v864_v18 = vadd.f32 %v832_v47, %v1480_v7  ;;  %v1572_v5 = vmul.f32 0.24040814, %v1563_v21  ;;  %v680_v59 = vmul.f32 0.078250125, %v1549_v29  ;;  %v413_v2 = vld [vmem:[#allocation2 + $0xfb] sm:$0xff]  ;;  %v222_v47 = vld [vmem:[#allocation2 + $0x109] sm:$0xff] }
  0x6d   :  { %v474_v49 = vadd.f32 %v442_v3, %v378_v16  ;;  %v283_v41 = vadd.f32 %v251_v61, %v187_v62  ;;  %v1576_v20 = vadd.f32 %v1557_v43, %v678_v33  ;;  %v833_v7 = vmul.f32 0.36268348, %v1503_v9  ;;  %v509_v35 = vld [vmem:[#allocation2 + $0xfc] sm:$0xff] }
  0x6e   :  { %1089 = vst [vmem:[%s1762_s1 + $0x58] sm:$0xff] %v1057_v1  ;;  %v961_v22 = vadd.f32 %v864_v18, %v740_v12  ;;  %v188_v52 = vmul.f32 0.078250125, %v156_v44  ;;  %v443_v32 = vmul.f32 0.24040814, %v411_v4  ;;  %v1586_v57 = vadd.f32 %v1572_v5, %v679_v24 }
  0x6f   :  { %v379_v30 = vadd.f32 %v347_v6, %v283_v41  ;;  %v252_v31 = vmul.f32 0.24040814, %v220_v34  ;;  %v348_v37 = vmul.f32 0.36268348, %v1272_v23  ;;  %v539_v39 = vmul.f32 0.078250125, %v507_v50 }
  0x70   :  { %v1058_v38 = vadd.f32 %v961_v22, %v680_v59  ;;  %v681_v33 = vmul.f32 0.078250125, %v1563_v21  ;;  %v865_v10 = vadd.f32 %v833_v7, %v1507_v42  ;;  %v1588_v12 = vadd.f32 %v538_v11, %v474_v49  ;;  %v414_v50 = vld [vmem:[#allocation2 + $0x10b] sm:$0xff] }
  0x71   :  { %v475_v9 = vadd.f32 %v443_v32, %v379_v30  ;;  %v284_v48 = vadd.f32 %v252_v31, %v188_v52  ;;  %v834_v51 = vmul.f32 0.36268348, %v1531_v45  ;;  %v189_v17 = vmul.f32 0.078250125, %v157_v15  ;;  %v223_v22 = vld [vmem:[#allocation2 + $0x111] sm:$0xff] }
  0x72   :  { %1090 = vst [vmem:[%s1762_s1 + $0x60] sm:$0xff] %v1058_v38  ;;  %v962_v23 = vadd.f32 %v865_v10, %v741_v46  ;;  %v253_v27 = vmul.f32 0.24040814, %v221_v13  ;;  %v444_v28 = vmul.f32 0.24040814, %v412_v19  ;;  %v510_v15 = vld [vmem:[#allocation2 + $0x10c] sm:$0xff] }
  0x73   :  { %v1594_v42 = vadd.f32 %v539_v39, %v475_v9  ;;  %v380_v8 = vadd.f32 %v348_v37, %v284_v48  ;;  %v349_v54 = vmul.f32 0.36268348, %v1289_v25  ;;  %v540_v24 = vmul.f32 0.078250125, %v508_v56  ;;  %v160_v39 = vld [vmem:[#allocation2 + $0x120] sm:$0xff]  ;;  %v415_v56 = vld [vmem:[#allocation2 + $0x113] sm:$0xff] }
  0x74   :  { %v1059_v14 = vadd.f32 %v962_v23, %v681_v33  ;;  %v866_v55 = vadd.f32 %v834_v51, %v1521_v53  ;;  %v285_v60 = vadd.f32 %v253_v27, %v189_v17  ;;  %v744_v46 = vmul.f32 0.24040814, %v1588_v12  ;;  %v159_v53 = vld [vmem:[#allocation2 + $0x110] sm:$0xff] }
  0x75   :  { %v476_v62 = vadd.f32 %v444_v28, %v380_v8  ;;  %v682_v45 = vmul.f32 0.078250125, %v1588_v12  ;;  %v445_v44 = vmul.f32 0.24040814, %v413_v2  ;;  %v835_v3 = vmul.f32 0.36268348, %v1537_v40 }
  0x76   :  { %1091 = vst [vmem:[%s1762_s1 + $0x68] sm:$0xff] %v1059_v14  ;;  %v963_v25 = vadd.f32 %v866_v55, %v1557_v43  ;;  %v381_v16 = vadd.f32 %v349_v54, %v285_v60  ;;  %v190_v61 = vmul.f32 0.078250125, %v158_v58  ;;  %v745_v6 = vmul.f32 0.24040814, %v1594_v42  ;;  %v224_v2 = vld [vmem:[#allocation2 + $0x121] sm:$0xff] }
  0x77   :  { %v1606_v1 = vadd.f32 %v540_v24, %v476_v62  ;;  %v254_v11 = vmul.f32 0.24040814, %v222_v47  ;;  %v350_v18 = vmul.f32 0.36268348, %v1294_v26  ;;  %v541_v49 = vmul.f32 0.078250125, %v509_v35 }
  0x78   :  { %v1060_v4 = vadd.f32 %v963_v25, %v682_v45  ;;  %v477_v34 = vadd.f32 %v445_v44, %v381_v16  ;;  %v867_v41 = vadd.f32 %v835_v3, %v1529_v63  ;;  %v1610_v43 = vadd.f32 %v744_v46, %v680_v59  ;;  %v319_v59 = vld [vmem:[#allocation2 + $0x112] sm:$0xff]  ;;  %v320_v28 = vld [vmem:[#allocation2 + $0x122] sm:$0xff] }
  0x79   :  { %v1613_v40 = vmul.f32 0.24040814, %v1606_v1  ;;  %v683_v7 = vmul.f32 0.078250125, %v1594_v42  ;;  %v286_v52 = vadd.f32 %v254_v11, %v190_v61  ;;  %v836_v63 = vmul.f32 0.36268348, %v1549_v29 }
  0x7a   :  { %1092 = vst [vmem:[%s1762_s1 + $0x70] sm:$0xff] %v1060_v4  ;;  %v1619_v26 = vadd.f32 %v541_v49, %v477_v34  ;;  %v964_v13 = vadd.f32 %v867_v41, %v1572_v5  ;;  %v191_v30 = vmul.f32 0.078250125, %v159_v53  ;;  %v1623_v32 = vadd.f32 %v745_v6, %v681_v33  ;;  %v511_v33 = vld [vmem:[#allocation2 + $0x114] sm:$0xff]  ;;  %v161_v55 = vld [vmem:[#allocation2 + $0x128] sm:$0xff] }
  0x7b   :  { %v382_v31 = vadd.f32 %v350_v18, %v286_v52  ;;  %v446_v37 = vmul.f32 0.24040814, %v414_v50  ;;  %v255_v38 = vmul.f32 0.24040814, %v223_v22  ;;  %v542_v19 = vmul.f32 0.078250125, %v510_v15 }
  0x7c   :  { %v1061_v10 = vadd.f32 %v964_v13, %v683_v7  ;;  %v684_v9 = vmul.f32 0.078250125, %v1606_v1  ;;  %v868_v48 = vadd.f32 %v836_v63, %v1554_v36  ;;  %v1628_v5 = vmul.f32 0.24040814, %v1619_v26  ;;  %v225_v60 = vld [vmem:[#allocation2 + $0x129] sm:$0xff]  ;;  %v162_v22 = vld [vmem:[#allocation2 + $0x138] sm:$0xff] }
  0x7d   :  { %v478_v29 = vadd.f32 %v446_v37, %v382_v31  ;;  %v287_v23 = vadd.f32 %v255_v38, %v191_v30  ;;  %v351_v51 = vmul.f32 0.36268348, %v319_v59  ;;  %v1631_v17 = vadd.f32 %v1613_v40, %v682_v45  ;;  %v416_v44 = vld [vmem:[#allocation2 + $0x123] sm:$0xff]  ;;  %v417_v53 = vld [vmem:[#allocation2 + $0x12b] sm:$0xff]  ;;  %v226_v30 = vld [vmem:[#allocation2 + $0x139] sm:$0xff] }
  0x7e   :  { %1093 = vst [vmem:[%s1762_s1 + $0x78] sm:$0xff] %v1061_v10  ;;  %v965_v27 = vadd.f32 %v868_v48, %v744_v46  ;;  %v837_v8 = vmul.f32 0.36268348, %v1563_v21  ;;  %v192_v36 = vmul.f32 0.078250125, %v160_v39  ;;  %v1644_v46 = vadd.f32 %v1628_v5, %v683_v7  ;;  %v512_v3 = vld [vmem:[#allocation2 + $0x124] sm:$0xff] }
  0x7f   :  { %v1637_v54 = vadd.f32 %v542_v19, %v478_v29  ;;  %v383_v58 = vadd.f32 %v351_v51, %v287_v23  ;;  %v447_v14 = vmul.f32 0.24040814, %v415_v56  ;;  %v256_v24 = vmul.f32 0.24040814, %v224_v2  ;;  %v321_v61 = vld [vmem:[#allocation2 + $0x12a] sm:$0xff]  ;;  %v322_v10 = vld [vmem:[#allocation2 + $0x13a] sm:$0xff] }
  0x80   :  { %v1062_v35 = vadd.f32 %v965_v27, %v684_v9  ;;  %v543_v47 = vmul.f32 0.078250125, %v511_v33  ;;  %v1640_v62 = vmul.f32 0.078250125, %v1619_v26  ;;  %v869_v45 = vadd.f32 %v837_v8, %v1568_v0  ;;  %v513_v63 = vld [vmem:[#allocation2 + $0x12c] sm:$0xff]  ;;  %v418_v19 = vld [vmem:[#allocation2 + $0x13b] sm:$0xff] }
  0x81   :  { %v479_v21 = vadd.f32 %v447_v14, %v383_v58  ;;  %v288_v25 = vadd.f32 %v256_v24, %v192_v36  ;;  %v352_v16 = vmul.f32 0.36268348, %v320_v28  ;;  %v838_v18 = vmul.f32 0.36268348, %v1588_v12  ;;  %v163_v23 = vld [vmem:[#allocation2 + $0x140] sm:$0xff] }
  0x82   :  { %1094 = vst [vmem:[%s1762_s1 + $0x80] sm:$0xff] %v1062_v35  ;;  %v966_v11 = vadd.f32 %v869_v45, %v745_v6  ;;  %v193_v4 = vmul.f32 0.078250125, %v161_v55  ;;  %v257_v34 = vmul.f32 0.24040814, %v225_v60  ;;  %v514_v8 = vld [vmem:[#allocation2 + $0x13c] sm:$0xff] }
  0x83   :  { %v748_v0 = vmul.f32 0.24040814, %v1637_v54  ;;  %v1651_v49 = vadd.f32 %v543_v47, %v479_v21  ;;  %v384_v41 = vadd.f32 %v352_v16, %v288_v25  ;;  %v448_v50 = vmul.f32 0.24040814, %v416_v44  ;;  %v227_v36 = vld [vmem:[#allocation2 + $0x141] sm:$0xff] }
  0x84   :  { %v1063_v7 = vadd.f32 %v966_v11, %v1640_v62  ;;  %v870_v52 = vadd.f32 %v838_v18, %v1576_v20  ;;  %v289_v15 = vadd.f32 %v257_v34, %v193_v4  ;;  %v353_v13 = vmul.f32 0.36268348, %v321_v61  ;;  %v419_v35 = vld [vmem:[#allocation2 + $0x143] sm:$0xff]  ;;  %v164_v11 = vld [vmem:[#allocation2 + $0x150] sm:$0xff] }
  0x85   :  { %v480_v6 = vadd.f32 %v448_v50, %v384_v41  ;;  %v544_v59 = vmul.f32 0.078250125, %v512_v3  ;;  %v1656_v12 = vmul.f32 0.078250125, %v1637_v54  ;;  %v449_v31 = vmul.f32 0.24040814, %v417_v53 }
  0x86   :  { %1095 = vst [vmem:[%s1762_s1 + $0x88] sm:$0xff] %v1063_v7  ;;  %v967_v37 = vadd.f32 %v870_v52, %v1613_v40  ;;  %v385_v38 = vadd.f32 %v353_v13, %v289_v15  ;;  %v839_v39 = vmul.f32 0.36268348, %v1594_v42  ;;  %v194_v20 = vmul.f32 0.078250125, %v162_v22  ;;  %v323_v42 = vld [vmem:[#allocation2 + $0x142] sm:$0xff] }
  0x87   :  { %v1663_v48 = vadd.f32 %v748_v0, %v684_v9  ;;  %v749_v56 = vmul.f32 0.24040814, %v1651_v49  ;;  %v1666_v2 = vadd.f32 %v544_v59, %v480_v6  ;;  %v258_v29 = vmul.f32 0.24040814, %v226_v30  ;;  %v515_v47 = vld [vmem:[#allocation2 + $0x144] sm:$0xff]  ;;  %v228_v34 = vld [vmem:[#allocation2 + $0x151] sm:$0xff] }
  0x88   :  { %v1064_v51 = vadd.f32 %v967_v37, %v1656_v12  ;;  %v481_v33 = vadd.f32 %v449_v31, %v385_v38  ;;  %v545_v27 = vmul.f32 0.078250125, %v513_v63  ;;  %v871_v40 = vadd.f32 %v839_v39, %v1586_v57  ;;  %v324_v63 = vld [vmem:[#allocation2 + $0x152] sm:$0xff] }
  0x89   :  { %v1671_v28 = vmul.f32 0.078250125, %v1651_v49  ;;  %v290_v9 = vadd.f32 %v258_v29, %v194_v20  ;;  %v354_v58 = vmul.f32 0.36268348, %v322_v10  ;;  %v450_v14 = vmul.f32 0.24040814, %v418_v19 }
  0x8a   :  { %1096 = vst [vmem:[%s1762_s1 + $0x90] sm:$0xff] %v1064_v51  ;;  %v1676_v24 = vadd.f32 %v545_v27, %v481_v33  ;;  %v968_v55 = vadd.f32 %v871_v40, %v1628_v5  ;;  %v840_v60 = vmul.f32 0.36268348, %v1606_v1  ;;  %v195_v57 = vmul.f32 0.078250125, %v163_v23  ;;  %v420_v38 = vld [vmem:[#allocation2 + $0x153] sm:$0xff] }
  0x8b   :  { %v750_v45 = vmul.f32 0.24040814, %v1666_v2  ;;  %v386_v44 = vadd.f32 %v354_v58, %v290_v9  ;;  %v546_v21 = vmul.f32 0.078250125, %v514_v8  ;;  %v259_v25 = vmul.f32 0.24040814, %v227_v36 }
  0x8c   :  { %v1065_v16 = vadd.f32 %v968_v55, %v1671_v28  ;;  %v688_v3 = vmul.f32 0.078250125, %v1666_v2  ;;  %v872_v61 = vadd.f32 %v840_v60, %v1610_v43  ;;  %v355_v53 = vmul.f32 0.36268348, %v323_v42  ;;  %v516_v23 = vld [vmem:[#allocation2 + $0x154] sm:$0xff]  ;;  %v166_v42 = vld [vmem:[#allocation2 + $0x168] sm:$0xff] }
  0x8d   :  { %v751_v5 = vmul.f32 0.24040814, %v1676_v24  ;;  %v482_v18 = vadd.f32 %v450_v14, %v386_v44  ;;  %v291_v1 = vadd.f32 %v259_v25, %v195_v57  ;;  %v451_v4 = vmul.f32 0.24040814, %v419_v35  ;;  %v165_v51 = vld [vmem:[#allocation2 + $0x158] sm:$0xff]  ;;  %v230_v14 = vld [vmem:[#allocation2 + $0x169] sm:$0xff] }
  0x8e   :  { %1097 = vst [vmem:[%s1762_s1 + $0x98] sm:$0xff] %v1065_v16  ;;  %v969_v41 = vadd.f32 %v872_v61, %v748_v0  ;;  %v547_v50 = vmul.f32 0.078250125, %v515_v47  ;;  %v841_v22 = vmul.f32 0.36268348, %v1619_v26  ;;  %v229_v33 = vld [vmem:[#allocation2 + $0x159] sm:$0xff]  ;;  %v782_v9 = vadd.f32 %v750_v45, %v1656_v12 }
  0x8f   :  { %v842_v7 = vmul.f32 0.36268348, %v1637_v54  ;;  %v1690_v52 = vadd.f32 %v546_v21, %v482_v18  ;;  %v387_v43 = vadd.f32 %v355_v53, %v291_v1  ;;  %v843_v15 = vmul.f32 0.36268348, %v1651_v49  ;;  %v325_v36 = vld [vmem:[#allocation2 + $0x15a] sm:$0xff]  ;;  %v326_v55 = vld [vmem:[#allocation2 + $0x16a] sm:$0xff] }
  0x90   :  { %v196_v13 = vmul.f32 0.078250125, %v164_v11  ;;  %v1066_v30 = vadd.f32 %v969_v41, %v688_v3  ;;  %v873_v6 = vadd.f32 %v841_v22, %v1623_v32  ;;  %v260_v31 = vmul.f32 0.24040814, %v228_v34  ;;  %v421_v44 = vld [vmem:[#allocation2 + $0x15b] sm:$0xff]  ;;  %v422_v11 = vld [vmem:[#allocation2 + $0x16b] sm:$0xff] }
  0x91   :  { %v874_v59 = vadd.f32 %v842_v7, %v1631_v17  ;;  %v483_v37 = vadd.f32 %v451_v4, %v387_v43  ;;  %v1696_v0 = vmul.f32 0.078250125, %v1676_v24  ;;  %v1699_v26 = vmul.f32 0.078250125, %v1690_v52  ;;  %v517_v21 = vld [vmem:[#allocation2 + $0x15c] sm:$0xff]  ;;  %v231_v22 = vld [vmem:[#allocation2 + $0x171] sm:$0xff] }
  0x92   :  { %v875_v54 = vadd.f32 %v843_v15, %v1644_v46  ;;  %1098 = vst [vmem:[%s1762_s1 + $0xa0] sm:$0xff] %v1066_v30  ;;  %v970_v49 = vadd.f32 %v873_v6, %v749_v56  ;;  %v292_v32 = vadd.f32 %v260_v31, %v196_v13  ;;  %v356_v20 = vmul.f32 0.36268348, %v324_v63  ;;  %v327_v7 = vld [vmem:[#allocation2 + $0x172] sm:$0xff] }
  0x93   :  { %v971_v39 = vadd.f32 %v874_v59, %v750_v45  ;;  %v781_v17 = vadd.f32 %v749_v56, %v1640_v62  ;;  %v752_v10 = vmul.f32 0.24040814, %v1690_v52  ;;  %v1707_v19 = vadd.f32 %v547_v50, %v483_v37  ;;  %v518_v6 = vld [vmem:[#allocation2 + $0x16c] sm:$0xff] }
  0x94   :  { %v972_v29 = vadd.f32 %v875_v54, %v751_v5  ;;  %v1067_v46 = vadd.f32 %v970_v49, %v1696_v0  ;;  %v388_v40 = vadd.f32 %v356_v20, %v292_v32  ;;  %v452_v8 = vmul.f32 0.24040814, %v420_v38 }
  0x95   :  { %v1068_v27 = vadd.f32 %v971_v39, %v1699_v26  ;;  %v783_v62 = vadd.f32 %v751_v5, %v1671_v28  ;;  %v1714_v56 = vmul.f32 0.078250125, %v1707_v19  ;;  %v844_v58 = vmul.f32 0.36268348, %v1666_v2  ;;  %v167_v5 = vld [vmem:[#allocation2 + $0x170] sm:$0xff] }
  0x96   :  { %1099 = vst [vmem:[%s1762_s1 + $0xa8] sm:$0xff] %v1067_v46  ;;  %v484_v60 = vadd.f32 %v452_v8, %v388_v40  ;;  %v548_v57 = vmul.f32 0.078250125, %v516_v23  ;;  %v197_v12 = vmul.f32 0.078250125, %v165_v51  ;;  %v784_v28 = vadd.f32 %v752_v10, %v688_v3  ;;  %v423_v39 = vld [vmem:[#allocation2 + $0x173] sm:$0xff] }
  0x97   :  { %1100 = vst [vmem:[%s1762_s1 + $0xb0] sm:$0xff] %v1068_v27  ;;  %v261_v35 = vmul.f32 0.24040814, %v229_v33  ;;  %v753_v47 = vmul.f32 0.24040814, %v1707_v19  ;;  %v1069_v45 = vadd.f32 %v972_v29, %v1714_v56  ;;  %v876_v2 = vadd.f32 %v844_v58, %v1663_v48  ;;  %v519_v51 = vld [vmem:[#allocation2 + $0x174] sm:$0xff] }
  0x98   :  { %v580_v25 = vadd.f32 %v548_v57, %v484_v60  ;;  %v357_v61 = vmul.f32 0.36268348, %v325_v36  ;;  %v845_v53 = vmul.f32 0.36268348, %v1676_v24  ;;  %v198_v18 = vmul.f32 0.078250125, %v166_v42 }
  0x99   :  { %v293_v16 = vadd.f32 %v261_v35, %v197_v12  ;;  %1101 = vst [vmem:[%s1762_s1 + $0xb8] sm:$0xff] %v1069_v45  ;;  %v973_v3 = vadd.f32 %v876_v2, %v752_v10  ;;  %v262_v1 = vmul.f32 0.24040814, %v230_v14  ;;  %v358_v4 = vmul.f32 0.36268348, %v326_v55 }
  0x9a   :  { %v1038_v34 = vmul.f32 0.078250125, %v580_v25  ;;  %v453_v48 = vmul.f32 0.24040814, %v421_v44  ;;  %v877_v50 = vadd.f32 %v845_v53, %v781_v17  ;;  %v549_v43 = vmul.f32 0.078250125, %v517_v21 }
  0x9b   :  { %v389_v41 = vadd.f32 %v357_v61, %v293_v16  ;;  %v294_v15 = vadd.f32 %v262_v1, %v198_v18  ;;  %v454_v13 = vmul.f32 0.24040814, %v422_v11  ;;  %v846_v24 = vmul.f32 0.36268348, %v1690_v52 }
  0x9c   :  { %v1070_v63 = vadd.f32 %v1038_v34, %v973_v3  ;;  %v754_v59 = vmul.f32 0.24040814, %v580_v25  ;;  %v199_v31 = vmul.f32 0.078250125, %v167_v5  ;;  %v263_v38 = vmul.f32 0.24040814, %v231_v22 }
  0x9d   :  { %v485_v30 = vadd.f32 %v453_v48, %v389_v41  ;;  %v390_v37 = vadd.f32 %v358_v4, %v294_v15  ;;  %v878_v54 = vadd.f32 %v846_v24, %v782_v9  ;;  %v359_v49 = vmul.f32 0.36268348, %v327_v7 }
  0x9e   :  { %v785_v32 = vadd.f32 %v753_v47, %v1696_v0  ;;  %1102 = vst [vmem:[%s1762_s1 + $0xc0] sm:$0xff] %v1070_v63  ;;  %v974_v17 = vadd.f32 %v877_v50, %v753_v47  ;;  %v847_v52 = vmul.f32 0.36268348, %v1707_v19  ;;  %v550_v29 = vmul.f32 0.078250125, %v518_v6 }
  0x9f   :  { %v581_v20 = vadd.f32 %v549_v43, %v485_v30  ;;  %v486_v10 = vadd.f32 %v454_v13, %v390_v37  ;;  %v295_v23 = vadd.f32 %v263_v38, %v199_v31  ;;  %v848_v33 = vmul.f32 0.36268348, %v580_v25 }
  0xa0   :  { %v975_v27 = vadd.f32 %v878_v54, %v754_v59  ;;  %v455_v40 = vmul.f32 0.24040814, %v423_v39  ;;  %v879_v8 = vadd.f32 %v847_v52, %v783_v62  ;;  %v786_v9 = vadd.f32 %v754_v59, %v1699_v26 }
  0xa1   :  { %v1039_v46 = vmul.f32 0.078250125, %v581_v20  ;;  %v582_v36 = vadd.f32 %v550_v29, %v486_v10  ;;  %v391_v42 = vadd.f32 %v359_v49, %v295_v23  ;;  %v880_v0 = vadd.f32 %v848_v33, %v784_v28 }
  0xa2   :  { %v551_v14 = vmul.f32 0.078250125, %v519_v51  ;;  %v755_v55 = vmul.f32 0.24040814, %v581_v20  ;;  %v849_v60 = vmul.f32 0.36268348, %v581_v20 }
  0xa3   :  { %v1071_v58 = vadd.f32 %v1039_v46, %v974_v17  ;;  %v1040_v57 = vmul.f32 0.078250125, %v582_v36  ;;  %v487_v19 = vadd.f32 %v455_v40, %v391_v42  ;;  %v945_v12 = vmul.f32 0.24040814, %v582_v36 }
  0xa4   :  { %v850_v35 = vmul.f32 0.36268348, %v582_v36  ;;  %v976_v47 = vadd.f32 %v879_v8, %v755_v55  ;;  %v881_v45 = vadd.f32 %v849_v60, %v785_v32  ;;  %v787_v21 = vadd.f32 %v755_v55, %v1714_v56 }
  0xa5   :  { %1103 = vst [vmem:[%s1762_s1 + $0xc8] sm:$0xff] %v1071_v58  ;;  %v1072_v62 = vadd.f32 %v1040_v57, %v975_v27  ;;  %v583_v2 = vadd.f32 %v551_v14, %v487_v19  ;;  %v977_v44 = vadd.f32 %v945_v12, %v880_v0 }
  0xa6   :  { %v882_v28 = vadd.f32 %v850_v35, %v786_v9 }
  0xa7   :  { %1104 = vst [vmem:[%s1762_s1 + $0xd0] sm:$0xff] %v1072_v62  ;;  %v1041_v25 = vmul.f32 0.078250125, %v583_v2  ;;  %v1074_v16 = vadd.f32 %v1038_v34, %v977_v44  ;;  %v946_v61 = vmul.f32 0.24040814, %v583_v2 }
  0xa8   :  { %v979_v53 = vadd.f32 %v882_v28, %v754_v59  ;;  %v851_v11 = vmul.f32 0.36268348, %v583_v2 }
  0xa9   :  { %v1073_v5 = vadd.f32 %v1041_v25, %v976_v47  ;;  %1106 = vst [vmem:[%s1762_s1 + $0xe0] sm:$0xff] %v1074_v16  ;;  %v978_v3 = vadd.f32 %v946_v61, %v881_v45 }
  0xaa   :  { %v1076_v18 = vadd.f32 %v979_v53, %v1699_v26  ;;  %v883_v1 = vadd.f32 %v851_v11, %v787_v21 }
  0xab   :  { %1105 = vst [vmem:[%s1762_s1 + $0xd8] sm:$0xff] %v1073_v5  ;;  %v1075_v4 = vadd.f32 %v1039_v46, %v978_v3 }
  0xac   :  { %1108 = vst [vmem:[%s1762_s1 + $0xf0] sm:$0xff] %v1076_v18  ;;  %v980_v34 = vadd.f32 %v883_v1, %v755_v55 }
  0xad   :  { %1107 = vst [vmem:[%s1762_s1 + $0xe8] sm:$0xff] %v1075_v4 }
  0xae   :  { %v1077_v41 = vadd.f32 %v980_v34, %v1714_v56 }
  0xb0   :  { %1109 = vst [vmem:[%s1762_s1 + $0xf8] sm:$0xff] %v1077_v41 }

</bundles_post_ra>
